<compile_context>
chip_gen: v7x
topology: tpu7x:2x2x1
jax: 0.10.0
libtpu: 0.0.40
codegen_flags: <defaults>
</compile_context>

<pallas_src>
import functools

import jax
import jax.numpy as jnp
from jax import lax
from jax.experimental import pallas as pl
from jax.experimental.pallas import tpu as pltpu

EPS = 1e-5
_MIN_GRID_STEPS = 8       # keep the DMA/compute pipeline (and megacore) busy
_MIN_HW_FOR_PALLAS = 128  # below this the lane axis is mostly masked -> XLA


# --------------------------------------------------------------------------
# Budget / tiling helpers
# --------------------------------------------------------------------------
def _vmem_budget():
    """Returns (vmem_limit_bytes, per-block byte budget) for the current TPU."""
    try:
        cap = int(pltpu.get_tpu_info().vmem_capacity_bytes)
    except Exception:
        cap = 128 << 20  # conservative v5e/v6e default
    # Leave headroom under physical VMEM (v7x: 64 MiB); cap at 64 MiB on the
    # 128 MiB chips.
    vmem_limit = min(int(cap * 0.7), 64 << 20)
    # ~6 block-sized live buffers: double-buffered x input + output, plus
    # slack for the tiny style operand and Mosaic-internal scratch.
    return vmem_limit, vmem_limit // 6


def _sublane_step(itemsize):
    # Native sublane packing: f32 -> 8, bf16 -> 16, int8/fp8 -> 32.
    return max(8, 32 // max(1, itemsize))


def _pick_channel_tile(c, hw, itemsize, block_budget, n,
                       min_steps=_MIN_GRID_STEPS):
    """Channel tile for the single-pass kernel, or None if none fits."""
    step = _sublane_step(itemsize)
    if c % step != 0:
        # Irregular channel count: one full-C block (block dim == full array
        # dim is always legal), provided it fits the budget.
        return c if c * hw * itemsize <= block_budget else None
    divisors = [d for d in range(step, c + 1, step) if c % d == 0]
    fitting = [d for d in divisors if d * hw * itemsize <= block_budget]
    if not fitting:
        return None
    # Prefer the largest tile that still leaves enough grid steps for the
    # double-buffered pipeline to overlap DMA with compute; otherwise take the
    # smallest fitting tile to maximize step count.
    good = [d for d in fitting if n * (c // d) >= min_steps]
    return max(good) if good else min(fitting)


def _pick_hw_tile(hw, tc, itemsize, block_budget):
    """Lane tile (multiple of 128) for the two-pass (large-HW) path."""
    max_lanes = max(128, (block_budget // max(1, tc * itemsize)) // 128 * 128)
    return int(min(max_lanes, pl.cdiv(hw, 128) * 128))


# --------------------------------------------------------------------------
# Kernels
# --------------------------------------------------------------------------
def _adain_onepass_kernel(x_ref, gb_ref, o_ref, *, inv_hw):
    # x_ref: (TC, HW)   gb_ref: (2, TC, 1)   o_ref: (TC, HW)
    x = x_ref[...].astype(jnp.float32)
    # One-pass biased statistics over the lane (spatial) axis.  The tile lives
    # in VMEM; the extra re-read for the squared sum is free filler while the
    # kernel sits on the HBM roofline.
    s1 = jnp.sum(x, axis=-1, keepdims=True)
    s2 = jnp.sum(x * x, axis=-1, keepdims=True)
    mean = s1 * inv_hw
    var = s2 * inv_hw - mean * mean
    gamma = gb_ref[0].astype(jnp.float32)       # (TC, 1)
    beta = gb_ref[1].astype(jnp.float32)        # (TC, 1)
    scale = gamma * lax.rsqrt(var + EPS)
    shift = beta - scale * mean
    # Single fused multiply-add; lane-dense full-width store.
    o_ref[...] = (x * scale + shift).astype(o_ref.dtype)


def _adain_stats_kernel(x_ref, stats_ref, *, hw, thw, needs_mask):
    # Accumulate [sum(x), sum(x*x)] per channel across HW tiles.
    # stats_ref: (TC, 2) resident output block (same block across the HW axis).
    hi = pl.program_id(2)

    @pl.when(hi == 0)
    def _():
        stats_ref[...] = jnp.zeros_like(stats_ref)

    x = x_ref[...].astype(jnp.float32)          # (TC, THW)
    if needs_mask:
        lane = lax.broadcasted_iota(jnp.int32, x.shape, 1) + hi * thw
        x = jnp.where(lane < hw, x, 0.0)
    stats_ref[:, 0:1] += jnp.sum(x, axis=-1, keepdims=True)
    stats_ref[:, 1:2] += jnp.sum(x * x, axis=-1, keepdims=True)


def _adain_apply_kernel(x_ref, ss_ref, o_ref):
    # ss_ref: (TC, 2) with [:, 0] = scale, [:, 1] = shift (precomputed in XLA).
    x = x_ref[...].astype(jnp.float32)
    scale = ss_ref[:, 0:1]
    shift = ss_ref[:, 1:2]
    o_ref[...] = (x * scale + shift).astype(o_ref.dtype)


# --------------------------------------------------------------------------
# Wrapper
# --------------------------------------------------------------------------
def adaptive_instance_norm(x, style, weight, bias, *, block_budget_bytes=None):
    """AdaIN forward.

    Args:
      x:      (N, C, H, W) input feature map (NCHW, like PyTorch).
      style:  (N, S) style latent.
      weight: (2C, S) raw nn.Linear weight (equalized-LR scale applied here).
      bias:   (2C,) linear bias.
      block_budget_bytes: optional per-block byte budget override (testing).
    Returns:
      (N, C, H, W) tensor, same dtype as x.
    """
    n, c, h, w = x.shape
    s_dim = style.shape[-1]
    hw = h * w

    # ---- Equalized-LR style affine: one small batched matmul in XLA ----
    # mmgen defaults: gain=sqrt(2), mode='fan_in', lr_mul=1.
    eqlr_scale = jnp.sqrt(jnp.asarray(2.0 / s_dim, dtype=jnp.float32))
    st = style.astype(jnp.float32) @ (weight.astype(jnp.float32) * eqlr_scale).T
    st = st + bias.astype(jnp.float32)           # (N, 2C)
    gamma = st[:, :c]                            # (N, C)
    beta = st[:, c:]                             # (N, C)

    # ---- Tiny-spatial layers (StyleGAN 4x4/8x8): pure-XLA dispatch ----
    if hw < _MIN_HW_FOR_PALLAS:
        xf = x.astype(jnp.float32)
        mean = jnp.mean(xf, axis=(2, 3), keepdims=True)
        var = jnp.mean(jnp.square(xf - mean), axis=(2, 3), keepdims=True)
        normed = (xf - mean) * lax.rsqrt(var + EPS)
        g4 = gamma.reshape(n, c, 1, 1)
        b4 = beta.reshape(n, c, 1, 1)
        return (g4 * normed + b4).astype(x.dtype)

    vmem_limit, auto_budget = _vmem_budget()
    block_budget = auto_budget if block_budget_bytes is None else block_budget_bytes
    itemsize = x.dtype.itemsize

    x3 = x.reshape(n, c, hw)
    tc = _pick_channel_tile(c, hw, itemsize, block_budget, n)

    if tc is not None:
        # ---- Single-pass path: whole spatial extent per block ----
        gb = st.reshape(n, 2, c)[..., None]      # (N, 2, C, 1) fused operand
        kernel = functools.partial(_adain_onepass_kernel, inv_hw=1.0 / hw)
        out = pl.pallas_call(
            kernel,
            out_shape=jax.ShapeDtypeStruct((n, c, hw), x.dtype),
            grid=(n, pl.cdiv(c, tc)),
            in_specs=[
                pl.BlockSpec((pl.Squeezed(), tc, hw),
                             lambda ni, ci: (ni, ci, 0)),
                pl.BlockSpec((pl.Squeezed(), 2, tc, 1),
                             lambda ni, ci: (ni, 0, ci, 0)),
            ],
            out_specs=pl.BlockSpec((pl.Squeezed(), tc, hw),
                                   lambda ni, ci: (ni, ci, 0)),
            compiler_params=pltpu.CompilerParams(
                dimension_semantics=("parallel", "parallel"),
                vmem_limit_bytes=vmem_limit),
        )(x3, gb)
        return out.reshape(n, c, h, w)

    # ---- Two-pass path for very large H*W (StyleGAN 512/1024 levels) ----
    step = _sublane_step(itemsize)
    tc2 = step if c >= step else c
    thw = _pick_hw_tile(hw, tc2, itemsize, block_budget)
    hw_tiles = pl.cdiv(hw, thw)
    needs_mask = (hw % thw) != 0

    stats_kernel = functools.partial(
        _adain_stats_kernel, hw=hw, thw=thw, needs_mask=needs_mask)
    stats = pl.pallas_call(
        stats_kernel,
        out_shape=jax.ShapeDtypeStruct((n, c, 2), jnp.float32),
        grid=(n, pl.cdiv(c, tc2), hw_tiles),
        in_specs=[pl.BlockSpec((pl.Squeezed(), tc2, thw),
                               lambda ni, ci, hi: (ni, ci, hi))],
        out_specs=pl.BlockSpec((pl.Squeezed(), tc2, 2),
                               lambda ni, ci, hi: (ni, ci, 0)),
        compiler_params=pltpu.CompilerParams(
            dimension_semantics=("parallel", "parallel", "arbitrary"),
            vmem_limit_bytes=vmem_limit),
    )(x3)

    mean = stats[..., 0] / hw                    # (N, C)
    var = stats[..., 1] / hw - mean * mean
    scale = gamma * lax.rsqrt(var + EPS)
    shift = beta - scale * mean
    ss = jnp.stack([scale, shift], axis=-1)      # (N, C, 2) f32

    out = pl.pallas_call(
        _adain_apply_kernel,
        out_shape=jax.ShapeDtypeStruct((n, c, hw), x.dtype),
        grid=(n, pl.cdiv(c, tc2), hw_tiles),
        in_specs=[
            pl.BlockSpec((pl.Squeezed(), tc2, thw),
                         lambda ni, ci, hi: (ni, ci, hi)),
            pl.BlockSpec((pl.Squeezed(), tc2, 2),
                         lambda ni, ci, hi: (ni, ci, 0)),
        ],
        out_specs=pl.BlockSpec((pl.Squeezed(), tc2, thw),
                               lambda ni, ci, hi: (ni, ci, hi)),
        compiler_params=pltpu.CompilerParams(
            dimension_semantics=("parallel", "parallel", "parallel"),
            vmem_limit_bytes=vmem_limit),
    )(x3, ss)
    return out.reshape(n, c, h, w)


# --------------------------------------------------------------------------
# Pure-JAX reference (two-pass variance, matches PyTorch InstanceNorm2d)
# --------------------------------------------------------------------------
def adaptive_instance_norm_ref(x, style, weight, bias):
    n, c, h, w = x.shape
    s_dim = style.shape[-1]
    scale = jnp.sqrt(2.0 / s_dim)
    st = style.astype(jnp.float32) @ (weight.astype(jnp.float32) * scale).T
    st = st + bias.astype(jnp.float32)           # (N, 2C)
    gamma = st[:, :c].reshape(n, c, 1, 1)
    beta = st[:, c:].reshape(n, c, 1, 1)
    xf = x.astype(jnp.float32)
    mean = jnp.mean(xf, axis=(2, 3), keepdims=True)
    var = jnp.mean((xf - mean) ** 2, axis=(2, 3), keepdims=True)
    normed = (xf - mean) * lax.rsqrt(var + EPS)
    return (gamma * normed + beta).astype(x.dtype)


if __name__ == "__main__":
    key = jax.random.PRNGKey(0)
    keys = jax.random.split(key, 10)
    STYLE_DIM = 8

    def make_case(kx, ks, kw, n, c, h, w):
        x = jax.random.normal(kx, (n, c, h, w), dtype=jnp.float32)
        style = jax.random.normal(ks, (n, STYLE_DIM), dtype=jnp.float32)
        weight = jax.random.normal(kw, (2 * c, STYLE_DIM), dtype=jnp.float32)
        # affine.bias.data[:C] = 1, [C:] = 0 (module init)
        bias = jnp.concatenate(
            [jnp.ones((c,), jnp.float32), jnp.zeros((c,), jnp.float32)])
        return x, style, weight, bias

    # 1) Module-default small shapes (full-C block, single-pass Pallas path).
    x, s, wgt, b = make_case(keys[0], keys[1], keys[2], 2, 4, 16, 16)
    out = jax.block_until_ready(adaptive_instance_norm(x, s, wgt, b))
    ref = adaptive_instance_norm_ref(x, s, wgt, b)
    assert out.shape == x.shape
    assert jnp.allclose(out, ref, atol=1e-4, rtol=1e-4), "case 1 mismatch"

    # 2) N=1, C=16: channel-tiled single-pass path + min-step heuristic.
    x, s, wgt, b = make_case(keys[3], keys[4], keys[5], 1, 16, 16, 16)
    out = jax.block_until_ready(adaptive_instance_norm(x, s, wgt, b))
    ref = adaptive_instance_norm_ref(x, s, wgt, b)
    assert jnp.allclose(out, ref, atol=1e-4, rtol=1e-4), "case 2 mismatch"

    # 3) Forced tiny block budget -> two-pass (stats + apply) path; ragged
    #    HW = 400 also exercises the lane mask in the stats kernel.
    x, s, wgt, b = make_case(keys[6], keys[7], keys[8], 1, 16, 20, 20)
    out = jax.block_until_ready(
        adaptive_instance_norm(x, s, wgt, b, block_budget_bytes=4096))
    ref = adaptive_instance_norm_ref(x, s, wgt, b)
    assert jnp.allclose(out, ref, atol=1e-4, rtol=1e-4), "case 3 mismatch"

    # 4) HW < 128 (StyleGAN 4x4 / 8x8 levels) -> XLA dispatch path.
    x, s, wgt, b = make_case(keys[9], keys[1], keys[2], 2, 4, 8, 8)
    out = jax.block_until_ready(adaptive_instance_norm(x, s, wgt, b))
    ref = adaptive_instance_norm_ref(x, s, wgt, b)
    assert jnp.allclose(out, ref, atol=1e-4, rtol=1e-4), "case 4 mismatch"

    print("KERNEL_OK")
</pallas_src>

<mosaic_0001>
module attributes {stable_mosaic.version = 11 : i64} {
  func.func @_adain_onepass_kernel(%arg0: i32, %arg1: i32, %arg2: memref<1x4x256xf32, #tpu.memory_space<vmem>>, %arg3: memref<1x2x4x1xf32, #tpu.memory_space<vmem>>, %arg4: memref<1x4x256xf32, #tpu.memory_space<vmem>>) attributes {dimension_semantics = [#tpu.dimension_semantics<parallel>, #tpu.dimension_semantics<parallel>], iteration_bounds = array<i64: 2, 1>, scalar_prefetch = 0 : i64, scratch_operands = 0 : i64, tpu.core_type = #tpu.core_type<tc>, window_params = [{transform_indices = @transform_0, window_bounds = array<i64: 1, 4, 256>}, {transform_indices = @transform_1, window_bounds = array<i64: 1, 2, 4, 1>}, {transform_indices = @transform_2, window_bounds = array<i64: 1, 4, 256>}]} {
    %c0 = arith.constant 0 : index
    %c0_0 = arith.constant 0 : index
    %c0_1 = arith.constant 0 : index
    %0 = vector.load %arg2[%c0, %c0_0, %c0_1] : memref<1x4x256xf32, #tpu.memory_space<vmem>>, vector<1x4x256xf32>
    %1 = vector.shape_cast %0 : vector<1x4x256xf32> to vector<4x256xf32>
    %cst = arith.constant dense<0.000000e+00> : vector<4xf32>
    %2 = vector.multi_reduction <add>, %1, %cst [1] : vector<4x256xf32> to vector<4xf32>
    %3 = vector.shape_cast %2 : vector<4xf32> to vector<4x1xf32>
    %4 = arith.mulf %1, %1 : vector<4x256xf32>
    %cst_2 = arith.constant dense<0.000000e+00> : vector<4xf32>
    %5 = vector.multi_reduction <add>, %4, %cst_2 [1] : vector<4x256xf32> to vector<4xf32>
    %6 = vector.shape_cast %5 : vector<4xf32> to vector<4x1xf32>
    %cst_3 = arith.constant 3.906250e-03 : f32
    %7 = vector.broadcast %cst_3 : f32 to vector<4x1xf32>
    %8 = arith.mulf %3, %7 : vector<4x1xf32>
    %cst_4 = arith.constant 3.906250e-03 : f32
    %9 = vector.broadcast %cst_4 : f32 to vector<4x1xf32>
    %10 = arith.mulf %6, %9 : vector<4x1xf32>
    %11 = arith.mulf %8, %8 : vector<4x1xf32>
    %12 = arith.subf %10, %11 : vector<4x1xf32>
    %c0_5 = arith.constant 0 : index
    %c0_6 = arith.constant 0 : index
    %c0_7 = arith.constant 0 : index
    %c0_8 = arith.constant 0 : index
    %13 = vector.load %arg3[%c0_5, %c0_6, %c0_7, %c0_8] : memref<1x2x4x1xf32, #tpu.memory_space<vmem>>, vector<1x1x4x1xf32>
    %14 = vector.shape_cast %13 : vector<1x1x4x1xf32> to vector<4x1xf32>
    %c0_9 = arith.constant 0 : index
    %c1 = arith.constant 1 : index
    %c0_10 = arith.constant 0 : index
    %c0_11 = arith.constant 0 : index
    %15 = vector.load %arg3[%c0_9, %c1, %c0_10, %c0_11] : memref<1x2x4x1xf32, #tpu.memory_space<vmem>>, vector<1x1x4x1xf32>
    %16 = vector.shape_cast %15 : vector<1x1x4x1xf32> to vector<4x1xf32>
    %cst_12 = arith.constant 9.99999974E-6 : f32
    %17 = vector.broadcast %cst_12 : f32 to vector<4x1xf32>
    %18 = arith.addf %12, %17 : vector<4x1xf32>
    %19 = math.rsqrt %18 : vector<4x1xf32>
    %20 = arith.mulf %14, %19 : vector<4x1xf32>
    %21 = arith.mulf %20, %8 : vector<4x1xf32>
    %22 = arith.subf %16, %21 : vector<4x1xf32>
    %23 = vector.broadcast %20 : vector<4x1xf32> to vector<4x256xf32>
    %24 = arith.mulf %1, %23 : vector<4x256xf32>
    %25 = vector.broadcast %22 : vector<4x1xf32> to vector<4x256xf32>
    %26 = arith.addf %24, %25 : vector<4x256xf32>
    %c0_13 = arith.constant 0 : index
    %c0_14 = arith.constant 0 : index
    %c0_15 = arith.constant 0 : index
    %27 = vector.load %arg4[%c0_13, %c0_14, %c0_15] : memref<1x4x256xf32, #tpu.memory_space<vmem>>, vector<1x4x256xf32>
    %28 = vector.shape_cast %27 : vector<1x4x256xf32> to vector<4x256xf32>
    %29 = vector.shape_cast %26 : vector<4x256xf32> to vector<1x4x256xf32>
    tpu.vector_store %arg4[%c0_13, %c0_14, %c0_15], %29 {strides = array<i32>} : memref<1x4x256xf32, #tpu.memory_space<vmem>>, vector<1x4x256xf32>,
    return
  }
  func.func @transform_0(%arg0: i32, %arg1: i32) -> (i32, i32, i32) {
    %c0_i32 = arith.constant 0 : i32
    %c0_i32_0 = arith.constant 0 : i32
    return %arg0, %arg1, %c0_i32 : i32, i32, i32
  }
  func.func @transform_1(%arg0: i32, %arg1: i32) -> (i32, i32, i32, i32) {
    %c0_i32 = arith.constant 0 : i32
    %c0_i32_0 = arith.constant 0 : i32
    %c0_i32_1 = arith.constant 0 : i32
    return %arg0, %c0_i32, %arg1, %c0_i32_0 : i32, i32, i32, i32
  }
  func.func @transform_2(%arg0: i32, %arg1: i32) -> (i32, i32, i32) {
    %c0_i32 = arith.constant 0 : i32
    %c0_i32_0 = arith.constant 0 : i32
    return %arg0, %arg1, %c0_i32 : i32, i32, i32
  }
}

</mosaic_0001>

<bundles_post_ra>
// kernel: tpu_custom_call.1
= control target key start
LH: loop header
LB: loop body
LE: loop exit
PB: predicated region body
PF: predicated region fallthrough
CT: control target
= control target key end

     0   :  { %7 = vsyncpa [#allocation3], 0  ;;  %s899_s0 = inlined_call_operand.hbm [shape: f32[2,4,256], index: 0, kind: input, shape index: {}]   ;;  %s900_s1 = inlined_call_operand.hbm [shape: f32[2,2,4,1], index: 1, kind: input, shape index: {}]   ;;  %s901_s2 = inlined_call_operand.hbm [shape: f32[2,4,256], index: 2, kind: output, shape index: {}]  }
   0x1   :  { %9 = vsyncpa [#allocation3 + $0x1], 0 }
   0x2   :  { %10 = vsyncpa [#allocation6], 0 }
   0x3   :  { %12 = vsyncpa [#allocation6 + $0x1], 0 }
   0x4   :  { %13 = vsyncpa [#allocation4], 0 }
   0x5   :  { %15 = vsyncpa [#allocation4 + $0x1], 0  ;;  %s674_s9 = smov 0   ;;  %s676_s10 = smov 0  }
   0x6   :  { %s678_s11 = smov 0   ;;  %s680_s12 = smov 0  }
   0x7   :  { %s682_s13 = smov 0   ;;  %s684_s14 = smov 0  }
   0x8 LB: > { %s405_s15 = sadd.s32 4294967295, %s650_s14   ;;  %s406_s16 = sadd.s32 4294967294, %s650_s14   ;;  %s650_s14 = sphi %s684_s14, %s21_s14   ;;  %s646_s13 = sphi %s682_s13, %s918_s13   ;;  %s642_s12 = sphi %s680_s12, %s917_s12   ;;  %s638_s11 = sphi %s678_s11, %s916_s11   ;;  %s634_s10 = sphi %s676_s10, %s915_s10   ;;  %s630_s9 = sphi %s674_s9, %s914_s9  }
   0x9   : > { %s33_s17 = sadd.s32 1, %s646_s13  ;;  %s42_s18 = sadd.s32 1, %s638_s11 }
   0xa   : > { %p35_p0 = scmp.ge.s32.totalorder %s33_s17, 2  ;;  %p49_p1 = scmp.ne.s32.totalorder %s638_s11, %s634_s10 }
   0xb   : > { %p50_p2 = scmp.eq.s32.totalorder %s650_s14, 0  ;;  %p55_p3 = scmp.ne.s32.totalorder %s634_s10, %s630_s9 }
   0xc   : > { %s920_s17 = smov (%p35_p0, %s33_s17), 0  ;;  %p56_p5 = scmp.eq.s32.totalorder %s405_s15, 0 }
   0xd   : > { %p715_p4 = por %p50_p2, %p49_p1  ;;  %s37_s20 = ssub.s32 %s646_s13, %s920_s17 }
   0xe   : > { %p109_p6 = scmp.eq.s32.totalorder %s405_s15, 1  ;;  %p40_p7 = scmp.eq.s32.totalorder %s37_s20, 0 }
   0xf   : > { %p721_p8 = por %p56_p5, %p55_p3  ;;  %p115_p10 = scmp.eq.s32.totalorder %s406_s16, 1 }
  0x10   : > { %p725_p9 = por %p109_p6, %p49_p1  ;;  %p445_p13 = scmp.lt.s32.totalorder %s650_s14, 2 }
  0x11   : > { %s905_s21 = scalar_select %p721_p8, 1, 0 }
  0x12   : > { %s906_s22 = scalar_select %p725_p9, 1, 0 }
  0x13   : > { %s730_s23 = scalar_select %p40_p7, %s638_s11, %s42_s18  }
  0x14   : > { %p732_p11 = por %p115_p10, %p55_p3  ;;  %s739_s25 = sand.u32 1, %s638_s11  }
  0x15   : > { %s409_s26 = sshll.u32 %s739_s25, 3  ;;  %s425_s27 = sshll.u32 %s646_s13, 7 }
  0x16   : > { %s907_s24 = scalar_select %p732_p11, 1, 0 }
  0x17   : > { %s746_s30 = scalar_lea.hbm %s899_s0, %s425_s27  ;;  %s139_s3 = scalar_lea.vmem [#allocation2], %s409_s26 }
  0x18   : > { %s149_s4 = sshll.u32 %s139_s3, 4  ;;  %p754_p0 = pnand %p445_p13, %p715_p4  ;;  %s750_s4 = int_to_ptr.vmem [resolvable:$true] %s149_s4 }
  0x19   : > { %s761_s8 = scalar_lea.hbm %s900_s1, %s425_s27  ;;  %s136_s15 = scalar_lea.sflag [#allocation3], %s739_s25 }
  0x1a   : > { %s504_s16 = scalar_lea.hbm %s746_s30, 128  ;;  %p506_p2 = pneg %p754_p0 }
  0x1b   : > { %p505_p1 = scmp.ne.s32.totalorder %s746_s30, %s504_s16  ;;  %s509_s20 = scalar_lea.hbm %s899_s0, 256 }
  0x1c   : > { %p510_p4 = scmp.lt.u32.totalorder %s746_s30, %s899_s0  ;;  %p511_p6 = scmp.lt.u32.totalorder %s509_s20, %s504_s16 }
  0x1d   : > { %p507_p3 = pnand %p506_p2, %p505_p1  ;;  %p513_p10 = scmp.lt.u32.totalorder %s504_s16, %s746_s30 }
  0x1e   : > { %p512_p7 = por %p511_p6, %p510_p4 }
  0x1f   : > { %p508_p5 = pneg %p507_p3 }
  0x20   : > { %p514_p13 = por %p513_p10, %p512_p7 }
  0x22   : > { %p515_p12 = pnand %p514_p13, %p508_p5 }
  0x24   : > { %518 = shalt.err (!%p515_p12)
}
  0x25   : > { %s519_s27 = scalar_lea.vmem %s750_s4, 128  ;;  %s652_s3 = smov [#allocation2]  }
  0x26   : > { %p520_p1 = scmp.ne.s32.totalorder %s750_s4, %s519_s27  ;;  %s524_s6 = sshll.u32 %s652_s3, 4  ;;  %s525_s6 = int_to_ptr.vmem [resolvable:$false] %s524_s6 }
  0x27   : > { %s526_s7 = scalar_lea.vmem %s525_s6, 256  ;;  %p527_p9 = scmp.lt.s32.totalorder %s750_s4, %s525_s6 }
  0x28   : > { %p522_p3 = pnand %p520_p1, %p506_p2  ;;  %p528_p4 = scmp.lt.s32.totalorder %s526_s7, %s519_s27 }
  0x2a   : > { %p523_p11 = pneg %p522_p3  ;;  %p529_p6 = por %p528_p4, %p527_p9 }
  0x2c   : > { %p530_p7 = pnand %p529_p6, %p523_p11 }
  0x2e   : > { %533 = shalt.err (!%p530_p7)
}
  0x2f   : > { %437 = dma.hbm_to_vmem [thread:$0]  (!%p754_p0), %s746_s30, 128, %s750_s4, %s136_s15  }
  0x30   : > { %s160_s16 = scalar_lea.vmem [#allocation5], %s409_s26  ;;  %p415_p9 = scmp.ge.s32.totalorder %s650_s14, 1 }
  0x31   : > { %s168_s18 = sshll.u32 %s160_s16, 4  ;;  %p176_p11 = scmp.lt.s32.totalorder %s650_s14, 3  ;;  %s792_s18 = int_to_ptr.vmem [resolvable:$true] %s168_s18 }
  0x32   : > { %s157_s20 = scalar_lea.sflag [#allocation6], %s739_s25  ;;  %s534_s28 = scalar_lea.hbm %s761_s8, 128 }
  0x33   : > { %p795_p12 = pnand %p415_p9, %p176_p11  ;;  %p535_p5 = scmp.ne.s32.totalorder %s761_s8, %s534_s28 }
  0x34   : > { %s539_s26 = scalar_lea.hbm %s900_s1, 256  ;;  %p540_p1 = scmp.lt.u32.totalorder %s761_s8, %s900_s1 }
  0x35   : > { %p537_p10 = pnand %p535_p5, %p506_p2  ;;  %p541_p3 = scmp.lt.u32.totalorder %s539_s26, %s534_s28 }
  0x36   : > { %p543_p6 = scmp.lt.u32.totalorder %s534_s28, %s761_s8 }
  0x37   : > { %p538_p13 = pneg %p537_p10  ;;  %p542_p4 = por %p541_p3, %p540_p1 }
  0x39   : > { %p544_p7 = por %p543_p6, %p542_p4 }
  0x3b   : > { %p545_p9 = pnand %p544_p7, %p538_p13 }
  0x3d   : > { %548 = shalt.err (!%p545_p9)
}
  0x3e   : > { %s549_s27 = scalar_lea.vmem %s792_s18, 128  ;;  %s653_s3 = smov [#allocation5]  }
  0x3f   : > { %p550_p11 = scmp.ne.s32.totalorder %s792_s18, %s549_s27  ;;  %s554_s6 = sshll.u32 %s653_s3, 4  ;;  %s555_s6 = int_to_ptr.vmem [resolvable:$false] %s554_s6 }
  0x40   : > { %s556_s7 = scalar_lea.vmem %s555_s6, 256  ;;  %p557_p8 = scmp.lt.s32.totalorder %s792_s18, %s555_s6 }
  0x41   : > { %p552_p5 = pnand %p550_p11, %p506_p2  ;;  %p558_p1 = scmp.lt.s32.totalorder %s556_s7, %s549_s27 }
  0x43   : > { %p553_p10 = pneg %p552_p5  ;;  %p559_p3 = por %p558_p1, %p557_p8 }
  0x45   : > { %p560_p4 = pnand %p559_p3, %p553_p10 }
  0x47   : > { %563 = shalt.err (!%p560_p4)
}
  0x48   : > { %s654_s16 = smov 64   ;;  %s655_s28 = smov 4  }
  0x49   : > { %440 = dma.hbm_to_vmem [thread:$0]  (!%p754_p0), %s761_s8, 128, %s792_s18, %s157_s20, %s654_s16, %s654_s16, %s655_s28  }
  0x4a   : > { %180 = sbr.rel (%p795_p12) target bundleno = 405 (0x195), region = 28  ;;  %s828_s30 = sand.u32 (!%p795_p12), 1, %s634_s10  }
  0x4b   : > { %s831_s4 = sshll.u32 (!%p795_p12), %s828_s30, 3  ;;  %s183_s26 = scalar_lea.sflag (!%p795_p12), [#allocation3], %s828_s30 }
  0x4c   : > { %s186_s15 = scalar_lea.vmem (!%p795_p12), [#allocation2], %s831_s4  ;;  %p910_p8 = scmp.ne.s32.totalorder (!%p795_p12), %s905_s21, 0 }
  0x51   : > { %617 = dma.done.wait (%p910_p8), %s183_s26, 128  }
  0x52   : > { %619 = vsyncadd (%p910_p8), %s183_s26, 4294967168  ;;  %s192_s25 = scalar_lea.sflag [#allocation6], %s828_s30  ;;  %s195_s5 = scalar_lea.vmem [#allocation5], %s831_s4 }
  0x53   : > { %621 = dma.done.wait (%p910_p8), %s192_s25, 128  }
  0x54   : > { %623 = vsyncadd (%p910_p8), %s192_s25, 4294967168  ;;  %vm225_vm0 = vcmask 1043456   ;;  %v221_v0 = vld [vmem:[%s186_s15] sm:$0xff]  ;;  %v656_v10 = vmov 0   ;;  %v244_v18 = vld [vmem:[%s195_s5] sm:$0xf]  ;;  %v259_v26 = vlaneseq }
  0x55   : > { %v223_v1 = vcombine.high %v221_v0, %v221_v0  ;;  %v226_v2 = vsel %vm225_vm0, %v221_v0, 0.0  ;;  %v231_v3 = vmul.f32 %v221_v0, %v221_v0  ;;  %499 = vset.pattern.permute.xlu1 %v656_v10  ;;  %500 = vset.pattern.permute.xlu0 %v656_v10  ;;  %v419_v21 = vld [vmem:[%s195_s5 + $0x4] sm:$0xf]  ;;  %v657_v24 = vmov 839922192   ;;  %s427_s21 = sshll.u32 %s642_s12, 7 }
  0x56   : > { %v257_v25 = vunpack.c.l.s4 %v657_v24  ;;  %v260_v28 = vshrl.u32 %v259_v26, 7  ;;  %s220_s8 = scalar_lea.vmem [#allocation7], %s831_s4  ;;  %s850_s29 = scalar_lea.hbm %s901_s2, %s427_s21 }
  0x57   : > { %v227_v4 = vsel %vm225_vm0, %v223_v1, 0.0  ;;  %v233_v5 = vcombine.high %v231_v3, %v231_v3  ;;  %v235_v6 = vsel %vm225_vm0, %v231_v3, 0.0  ;;  %s296_s18 = sshll.u32 %s220_s8, 4  ;;  %s280_s27 = scalar_lea.sflag [#allocation4], %s828_s30  ;;  %s852_s18 = int_to_ptr.vmem [resolvable:$true] %s296_s18 }
  0x58   : > { %v228_v7 = vadd.f32 %v227_v4, %v226_v2  ;;  %v258_v27 = vunpack.c.0.s8 %v257_v25  ;;  %s564_s3 = scalar_lea.vmem %s852_s18, 128  ;;  %p911_p2 = scmp.ne.s32.totalorder %s906_s22, 0 }
  0x59   : > { %v236_v8 = vsel %vm225_vm0, %v233_v5, 0.0  ;;  %p565_p0 = scmp.ne.s32.totalorder %s852_s18, %s564_s3  ;;  %s658_s12 = smov [#allocation7]  }
  0x5a   : > { %229 = vadd.xlane.f32.xlu0 %v228_v7  ;;  %v237_v9 = vadd.f32 %v236_v8, %v235_v6  ;;  %v261_v29 = vsub.s32 %v258_v27, %v260_v28  ;;  %s568_s6 = sshll.u32 %s658_s12, 4  ;;  %s569_s6 = int_to_ptr.vmem [resolvable:$false] %s568_s6 }
  0x5b   : > { %p566_p12 = pnand %p565_p0, %p911_p2  ;;  %s570_s7 = scalar_lea.vmem %s569_s6, 256 }
  0x5c   : > { %p571_p6 = scmp.lt.s32.totalorder %s852_s18, %s569_s6  ;;  %p572_p7 = scmp.lt.s32.totalorder %s570_s7, %s564_s3 }
  0x5d   : > { %p567_p13 = pneg %p566_p12 }
  0x5e   : > { %238 = vadd.xlane.f32.xlu0 %v237_v9  ;;  %p573_p9 = por %p572_p7, %p571_p6 }
  0x60   : > { %p574_p11 = pnand %p573_p9, %p567_p13 }
  0xe7   : > { %v230_v11 = vpop.xlane.xlu0 %229 }
  0xe8   : > { %v240_v12 = vmul.f32 0.00390625, %v230_v11 }
  0xea   : > { %v242_v14 = vmul.f32 %v240_v12, %v240_v12 }
  0xeb   : > { %v239_v13 = vpop.xlane.xlu0 %238 }
  0xec   : > { %v241_v15 = vmul.f32 0.00390625, %v239_v13 }
  0xee   : > { %v243_v16 = vsub.f32 %v241_v15, %v242_v14 }
  0xf0   : > { %v247_v17 = vadd.f32 1e-05, %v243_v16 }
  0xf2   : > { %502 = vrsqrt.f32 %v247_v17 }
  0xfc   : > { %v503_v19 = vpop.eup %502 }
  0xfd   : > { %v249_v20 = vmul.f32 %v503_v19, %v244_v18 }
  0xff   : > { %254 = vperm.xlu1 %499, %v249_v20   ;;  %v250_v22 = vmul.f32 %v249_v20, %v240_v12 }
 0x101   : > { %v251_v23 = vsub.f32 %v419_v21, %v250_v22 }
 0x103   : > { %267 = vperm.xlu1 %499, %v251_v23  }
 0x17e   : > { %v255_v30 = vpop.permute.xlu1 %254 }
 0x17f   : > { %v262_v31 = vrot.slane %v255_v30, %v261_v29 }
 0x181   : > { %v264_v33 = vmul.f32 %v262_v31, %v221_v0 }
 0x182   : > { %v268_v32 = vpop.permute.xlu1 %267 }
 0x183   : > { %v275_v34 = vrot.slane %v268_v32, %v261_v29 }
 0x185   : > { %v277_v35 = vadd.f32 %v275_v34, %v264_v33 }
 0x187   : > { %278 = vst [vmem:[%s220_s8] sm:$0xff] %v277_v35 }
 0x188   : > { %577 = shalt.err (!%p574_p11)
}
 0x189   : > { %s578_s16 = scalar_lea.hbm %s850_s29, 128  ;;  %s582_s4 = scalar_lea.hbm %s901_s2, 256 }
 0x18a   : > { %p579_p5 = scmp.ne.s32.totalorder %s850_s29, %s578_s16  ;;  %p583_p3 = scmp.lt.u32.totalorder %s850_s29, %s901_s2 }
 0x18b   : > { %p584_p4 = scmp.lt.u32.totalorder %s582_s4, %s578_s16  ;;  %p586_p0 = scmp.lt.u32.totalorder %s578_s16, %s850_s29 }
 0x18c   : > { %p580_p10 = pnand %p579_p5, %p911_p2 }
 0x18d   : > { %p585_p8 = por %p584_p4, %p583_p3 }
 0x18e   : > { %p581_p1 = pneg %p580_p10 }
 0x18f   : > { %p587_p12 = por %p586_p0, %p585_p8 }
 0x191   : > { %p588_p13 = pnand %p587_p12, %p581_p1 }
 0x193   : > { %591 = shalt.err (!%p588_p13)
}
 0x194   : > { %432 = dma.vmem_to_hbm [thread:$0]  (%p911_p2), %s852_s18, 128, %s850_s29, %s280_s27  }
 0x195 PF: > { %s308_s25 = sand.u32 1, %s630_s9   ;;  %p912_p6 = scmp.ne.s32.totalorder %s907_s24, 0 }
 0x196   : > { %p913_p7 = scmp.ge.s32.totalorder %s650_s14, 2  ;;  %s309_s5 = scalar_lea.sflag [#allocation4], %s308_s25 }
 0x198   : > { %p442_p9 = pnand %p913_p7, %p912_p6 }
 0x19a   : > { %625 = dma.done.wait (!%p442_p9), %s309_s5, 128  }
 0x19b   : > { %627 = vsyncadd (!%p442_p9), %s309_s5, 4294967168  ;;  %s21_s14 = sadd.s32 1, %s650_s14   ;;  %s914_s9 = smov %s634_s10 }
 0x19c   : > { %p18_p11 = scmp.ge.s32.totalorder %s21_s14, 4   ;;  %s915_s10 = smov %s638_s11 }
 0x19d   : > { %s916_s11 = smov %s730_s23  ;;  %s917_s12 = smov %s646_s13 }
 0x19e   : > { %s918_s13 = smov %s920_s17  ;;  %20 = sbr.rel (!%p18_p11) target bundleno = 8 (0x8), region = 87 }
 0x1a5   :  { %314 = vsyncpa [#allocation3], 1 }
 0x1a6   :  { %316 = vsyncpa [#allocation3 + $0x1], 1 }
 0x1a7   :  { %317 = vsyncpa [#allocation6], 1 }
 0x1a8   :  { %319 = vsyncpa [#allocation6 + $0x1], 1 }
 0x1a9   :  { %320 = vsyncpa [#allocation4], 1 }
 0x1aa   :  { %322 = vsyncpa [#allocation4 + $0x1], 1 }

</bundles_post_ra>
